<compile_context>
chip_gen: v7x
topology: tpu7x:2x2x1
jax: 0.10.0
libtpu: 0.0.40
codegen_flags: <defaults>
</compile_context>

<pallas_src>
import jax
import jax.numpy as jnp
from jax.experimental import pallas as pl
from jax.experimental.pallas import tpu as pltpu

HID_LAYER1_DIM = 256
HID_LAYER2_DIM = 128
WFINAL = 0.003
BN_EPS = 1e-5


def _round_up(x, m):
    return -(-x // m) * m


def _critic_kernel(state_ref, action_ref, slab_ref, out_ref):
    B, S = state_ref.shape
    A = action_ref.shape[1]
    H1, H2 = HID_LAYER1_DIM, HID_LAYER2_DIM

    # Static (trace-time) row offsets into the merged parameter slab.
    s_pad = _round_up(S, 8)
    a_pad = _round_up(A, 8)
    r_b1 = s_pad                 # b1 row (8-aligned)
    r_w2h = r_b1 + 8             # packed w2h' block (128 rows, 8-aligned)
    r_w2a = r_w2h + H2           # w2a rows + b3 scalar at lane 128 (8-aligned)
    r_tail = r_w2a + a_pad       # b2' (lanes 0:128) | w3 row (lanes 128:256)

    # ---- fc1 + ReLU -------------------------------------------------------
    w1 = slab_ref[0:S, :]
    b1 = slab_ref[r_b1:r_b1 + 1, :]
    h1 = jnp.dot(state_ref[...], w1, preferred_element_type=jnp.float32) + b1
    h1 = jnp.maximum(h1, 0.0)

    # ---- BatchNorm1d (training mode), one-pass batch stats ------------------
    # mean = E[x], var = E[x^2] - mean^2 (biased); affine folded into fc2.
    inv_b = 1.0 / B
    mean = jnp.sum(h1, axis=0, keepdims=True) * inv_b
    mean_sq = jnp.sum(h1 * h1, axis=0, keepdims=True) * inv_b
    var = mean_sq - mean * mean
    h1_std = (h1 - mean) * jax.lax.rsqrt(var + BN_EPS)

    # ---- fc2 on cat([h1_norm, action], 1) -----------------------------------
    # hidden path: w2h' packed two-wide -> two aligned K=128 MXU matmuls.
    w2h_lo = slab_ref[r_w2h:r_w2h + H2, 0:H2]
    w2h_hi = slab_ref[r_w2h:r_w2h + H2, H2:2 * H2]
    h2 = (jnp.dot(h1_std[:, 0:H2], w2h_lo, preferred_element_type=jnp.float32)
          + jnp.dot(h1_std[:, H2:2 * H2], w2h_hi,
                    preferred_element_type=jnp.float32))

    # action path: K=A is tiny -> unrolled VPU broadcast-FMAs, off the MXU.
    w2a = slab_ref[r_w2a:r_w2a + a_pad, 0:H2]     # one aligned (8,128) load
    act = action_ref[...]
    for k in range(A):
        h2 = h2 + act[:, k:k + 1] * w2a[k:k + 1, :]

    b2 = slab_ref[r_tail:r_tail + 1, 0:H2]
    h2 = jnp.maximum(h2 + b2, 0.0)

    # ---- fc3 -> Q value: VPU multiply + lane reduce (no N=1 MXU matmul) -----
    w3_row = slab_ref[r_tail:r_tail + 1, H2:2 * H2]
    b3 = slab_ref[r_w2a:r_w2a + 1, H2:H2 + 1]     # scalar parked lane-aligned
    out_ref[...] = jnp.sum(h2 * w3_row, axis=-1, keepdims=True) + b3


def pack_params(params):
    """Fold the BN affine into fc2 and pack everything into ONE weight slab.

    Slab layout (256 lanes wide, every block on an 8-row boundary):
      rows [0:S)             w1                             (all 256 lanes)
      row  s_pad             b1                             (all 256 lanes)
      rows [s_pad+8 : +128)  w2h'[0:128] | w2h'[128:256]    (lane halves)
      rows [r_w2a : +A)      w2a in lanes [0:128); b3 at (r_w2a, lane 128)
      row  r_tail            b2' in lanes [0:128) | w3 row in lanes [128:256)
    """
    w1 = params["w1"]                               # (S, 256)
    S = w1.shape[0]
    A = params["w2a"].shape[0]
    H1, H2 = HID_LAYER1_DIM, HID_LAYER2_DIM

    gamma = params["gamma"]                         # (1, 256)
    beta = params["beta"]                           # (1, 256)
    # (h1_std * gamma + beta) @ w2h == h1_std @ (gamma.T * w2h) + beta @ w2h
    w2h_folded = params["w2h"] * gamma.T            # (256, 128)
    b2_folded = params["b2"] + beta @ params["w2h"]  # (1, 128)

    s_pad = _round_up(S, 8)
    a_pad = _round_up(A, 8)
    r_b1 = s_pad
    r_w2h = r_b1 + 8
    r_w2a = r_w2h + H2
    r_tail = r_w2a + a_pad
    n_rows = r_tail + 8

    slab = jnp.zeros((n_rows, H1), jnp.float32)
    slab = slab.at[0:S, :].set(w1)
    slab = slab.at[r_b1, :].set(params["b1"][0])
    slab = slab.at[r_w2h:r_w2h + H2, 0:H2].set(w2h_folded[0:H2, :])
    slab = slab.at[r_w2h:r_w2h + H2, H2:2 * H2].set(w2h_folded[H2:2 * H2, :])
    slab = slab.at[r_w2a:r_w2a + A, 0:H2].set(params["w2a"])
    slab = slab.at[r_w2a, H2].set(params["b3"][0, 0])
    slab = slab.at[r_tail, 0:H2].set(b2_folded[0])
    slab = slab.at[r_tail, H2:2 * H2].set(params["w3"][:, 0])
    return slab


def critic_forward(state, action, slab):
    B, S = state.shape
    A = action.shape[1]
    flops = 2 * B * (S * HID_LAYER1_DIM
                     + (HID_LAYER1_DIM + A) * HID_LAYER2_DIM
                     + HID_LAYER2_DIM)
    bytes_accessed = 4 * (state.size + action.size + slab.size + B)
    vmem = pl.BlockSpec(memory_space=pltpu.MemorySpace.VMEM)
    return pl.pallas_call(
        _critic_kernel,
        out_shape=jax.ShapeDtypeStruct((B, 1), jnp.float32),
        in_specs=[vmem, vmem, vmem],
        out_specs=vmem,
        cost_estimate=pl.CostEstimate(flops=flops,
                                      transcendentals=HID_LAYER1_DIM,
                                      bytes_accessed=bytes_accessed),
    )(state, action, slab)


def init_params(key, state_dim, action_dim):
    """Deterministic init mirroring the torch module's shapes/init scheme.
    Weights are stored transposed vs. nn.Linear (x @ W + b convention)."""
    ks = jax.random.split(key, 8)

    def uniform(k, shape, w):
        return jax.random.uniform(k, shape, jnp.float32, minval=-w, maxval=w)

    # fc1: torch weight (256, stateDim); fanin_init uses size[0] = 256
    w1_bound = 1.0 / jnp.sqrt(jnp.float32(HID_LAYER1_DIM))
    w1 = uniform(ks[0], (state_dim, HID_LAYER1_DIM), w1_bound)
    b1 = uniform(ks[1], (1, HID_LAYER1_DIM), 1.0 / jnp.sqrt(jnp.float32(state_dim)))

    # BatchNorm1d affine params (torch default: gamma=1, beta=0)
    gamma = jnp.ones((1, HID_LAYER1_DIM), jnp.float32)
    beta = jnp.zeros((1, HID_LAYER1_DIM), jnp.float32)

    # fc2: torch weight (128, 256 + actionDim); fanin = size[0] = 128
    fc2_in = HID_LAYER1_DIM + action_dim
    w2_bound = 1.0 / jnp.sqrt(jnp.float32(HID_LAYER2_DIM))
    w2 = uniform(ks[2], (fc2_in, HID_LAYER2_DIM), w2_bound)
    w2h = w2[:HID_LAYER1_DIM, :]
    w2a = w2[HID_LAYER1_DIM:, :]
    b2 = uniform(ks[3], (1, HID_LAYER2_DIM), 1.0 / jnp.sqrt(jnp.float32(fc2_in)))

    # fc3: uniform(-WFINAL, WFINAL)
    w3 = uniform(ks[4], (HID_LAYER2_DIM, 1), WFINAL)
    b3 = uniform(ks[5], (1, 1), 1.0 / jnp.sqrt(jnp.float32(HID_LAYER2_DIM)))

    return {"w1": w1, "b1": b1, "gamma": gamma, "beta": beta,
            "w2h": w2h, "w2a": w2a, "b2": b2, "w3": w3, "b3": b3}


def critic_reference(state, action, params):
    """Pure-JAX reference (unfolded BN affine, two-pass stats)."""
    h1 = jnp.maximum(state @ params["w1"] + params["b1"], 0.0)
    mean = jnp.mean(h1, axis=0, keepdims=True)
    var = jnp.mean((h1 - mean) ** 2, axis=0, keepdims=True)
    h1n = (h1 - mean) / jnp.sqrt(var + BN_EPS) * params["gamma"] + params["beta"]
    h2 = jnp.maximum(h1n @ params["w2h"] + action @ params["w2a"] + params["b2"], 0.0)
    return h2 @ params["w3"] + params["b3"]


if __name__ == "__main__":
    B, STATE_DIM, ACTION_DIM = 8, 16, 4

    key = jax.random.PRNGKey(0)
    k_params, k_state, k_action, k_gamma, k_beta = jax.random.split(key, 5)

    params = init_params(k_params, STATE_DIM, ACTION_DIM)
    # Use non-trivial BN affine params so the fold path is genuinely exercised.
    params["gamma"] = 1.0 + 0.1 * jax.random.normal(
        k_gamma, (1, HID_LAYER1_DIM), jnp.float32)
    params["beta"] = 0.1 * jax.random.normal(
        k_beta, (1, HID_LAYER1_DIM), jnp.float32)

    slab = pack_params(params)   # pack ONCE; reuse across forward calls

    state = jax.random.normal(k_state, (B, STATE_DIM), jnp.float32)
    action = jax.random.normal(k_action, (B, ACTION_DIM), jnp.float32)

    q = critic_forward(state, action, slab)
    jax.block_until_ready(q)

    q_ref = critic_reference(state, action, params)
    assert q.shape == (B, 1)
    assert jnp.allclose(q, q_ref, atol=1e-3, rtol=1e-3), (q, q_ref)

    print("KERNEL_OK")
</pallas_src>

<mosaic_0001>
module attributes {stable_mosaic.version = 11 : i64} {
  func.func @_critic_kernel(%arg0: memref<8x16xf32, #tpu.memory_space<vmem>>, %arg1: memref<8x4xf32, #tpu.memory_space<vmem>>, %arg2: memref<168x256xf32, #tpu.memory_space<vmem>>, %arg3: memref<8x1xf32, #tpu.memory_space<vmem>>) attributes {dimension_semantics = [], scalar_prefetch = 0 : i64, scratch_operands = 0 : i64, tpu.core_type = #tpu.core_type<tc>} {
    %c0 = arith.constant 0 : index
    %c0_0 = arith.constant 0 : index
    %0 = vector.load %arg2[%c0, %c0_0] : memref<168x256xf32, #tpu.memory_space<vmem>>, vector<16x256xf32>
    %c16 = arith.constant 16 : index
    %c0_1 = arith.constant 0 : index
    %1 = vector.load %arg2[%c16, %c0_1] : memref<168x256xf32, #tpu.memory_space<vmem>>, vector<1x256xf32>
    %c0_2 = arith.constant 0 : index
    %c0_3 = arith.constant 0 : index
    %2 = vector.load %arg0[%c0_2, %c0_3] : memref<8x16xf32, #tpu.memory_space<vmem>>, vector<8x16xf32>
    %cst = arith.constant dense<0.000000e+00> : vector<8x256xf32>
    %3 = tpu.matmul %2, %0, %cst {dimension_numbers = #tpu.dot_dimension_numbers<[1], [0], [0], [1], [0, 0, 1, 1], [], []>} : vector<8x16xf32>, vector<16x256xf32>, vector<8x256xf32> -> vector<8x256xf32>
    %4 = vector.broadcast %1 : vector<1x256xf32> to vector<8x256xf32>
    %5 = arith.addf %3, %4 : vector<8x256xf32>
    %cst_4 = arith.constant 0.000000e+00 : f32
    %6 = vector.broadcast %cst_4 : f32 to vector<8x256xf32>
    %7 = arith.maximumf %5, %6 : vector<8x256xf32>
    %cst_5 = arith.constant dense<0.000000e+00> : vector<256xf32>
    %8 = vector.multi_reduction <add>, %7, %cst_5 [0] : vector<8x256xf32> to vector<256xf32>
    %9 = vector.shape_cast %8 : vector<256xf32> to vector<1x256xf32>
    %cst_6 = arith.constant 1.250000e-01 : f32
    %10 = vector.broadcast %cst_6 : f32 to vector<1x256xf32>
    %11 = arith.mulf %9, %10 : vector<1x256xf32>
    %12 = arith.mulf %7, %7 : vector<8x256xf32>
    %cst_7 = arith.constant dense<0.000000e+00> : vector<256xf32>
    %13 = vector.multi_reduction <add>, %12, %cst_7 [0] : vector<8x256xf32> to vector<256xf32>
    %14 = vector.shape_cast %13 : vector<256xf32> to vector<1x256xf32>
    %cst_8 = arith.constant 1.250000e-01 : f32
    %15 = vector.broadcast %cst_8 : f32 to vector<1x256xf32>
    %16 = arith.mulf %14, %15 : vector<1x256xf32>
    %17 = arith.mulf %11, %11 : vector<1x256xf32>
    %18 = arith.subf %16, %17 : vector<1x256xf32>
    %19 = vector.broadcast %11 : vector<1x256xf32> to vector<8x256xf32>
    %20 = arith.subf %7, %19 : vector<8x256xf32>
    %cst_9 = arith.constant 9.99999974E-6 : f32
    %21 = vector.broadcast %cst_9 : f32 to vector<1x256xf32>
    %22 = arith.addf %18, %21 : vector<1x256xf32>
    %23 = math.rsqrt %22 : vector<1x256xf32>
    %24 = vector.broadcast %23 : vector<1x256xf32> to vector<8x256xf32>
    %25 = arith.mulf %20, %24 : vector<8x256xf32>
    %c24 = arith.constant 24 : index
    %c0_10 = arith.constant 0 : index
    %26 = vector.load %arg2[%c24, %c0_10] : memref<168x256xf32, #tpu.memory_space<vmem>>, vector<128x128xf32>
    %c24_11 = arith.constant 24 : index
    %c128 = arith.constant 128 : index
    %27 = vector.load %arg2[%c24_11, %c128] : memref<168x256xf32, #tpu.memory_space<vmem>>, vector<128x128xf32>
    %28 = vector.extract_strided_slice %25 {offsets = [0, 0], sizes = [8, 128], strides = [1, 1]} : vector<8x256xf32> to vector<8x128xf32>
    %cst_12 = arith.constant dense<0.000000e+00> : vector<8x128xf32>
    %29 = tpu.matmul %28, %26, %cst_12 {dimension_numbers = #tpu.dot_dimension_numbers<[1], [0], [0], [1], [0, 0, 1, 1], [], []>} : vector<8x128xf32>, vector<128x128xf32>, vector<8x128xf32> -> vector<8x128xf32>
    %30 = vector.extract_strided_slice %25 {offsets = [0, 128], sizes = [8, 128], strides = [1, 1]} : vector<8x256xf32> to vector<8x128xf32>
    %cst_13 = arith.constant dense<0.000000e+00> : vector<8x128xf32>
    %31 = tpu.matmul %30, %27, %cst_13 {dimension_numbers = #tpu.dot_dimension_numbers<[1], [0], [0], [1], [0, 0, 1, 1], [], []>} : vector<8x128xf32>, vector<128x128xf32>, vector<8x128xf32> -> vector<8x128xf32>
    %32 = arith.addf %29, %31 : vector<8x128xf32>
    %c152 = arith.constant 152 : index
    %c0_14 = arith.constant 0 : index
    %33 = vector.load %arg2[%c152, %c0_14] : memref<168x256xf32, #tpu.memory_space<vmem>>, vector<8x128xf32>
    %c0_15 = arith.constant 0 : index
    %c0_16 = arith.constant 0 : index
    %34 = vector.load %arg1[%c0_15, %c0_16] : memref<8x4xf32, #tpu.memory_space<vmem>>, vector<8x4xf32>
    %35 = vector.extract_strided_slice %34 {offsets = [0, 0], sizes = [8, 1], strides = [1, 1]} : vector<8x4xf32> to vector<8x1xf32>
    %36 = vector.extract_strided_slice %33 {offsets = [0, 0], sizes = [1, 128], strides = [1, 1]} : vector<8x128xf32> to vector<1x128xf32>
    %37 = vector.broadcast %35 : vector<8x1xf32> to vector<8x128xf32>
    %38 = vector.broadcast %36 : vector<1x128xf32> to vector<8x128xf32>
    %39 = arith.mulf %37, %38 : vector<8x128xf32>
    %40 = arith.addf %32, %39 : vector<8x128xf32>
    %41 = vector.extract_strided_slice %34 {offsets = [0, 1], sizes = [8, 1], strides = [1, 1]} : vector<8x4xf32> to vector<8x1xf32>
    %42 = vector.extract_strided_slice %33 {offsets = [1, 0], sizes = [1, 128], strides = [1, 1]} : vector<8x128xf32> to vector<1x128xf32>
    %43 = vector.broadcast %41 : vector<8x1xf32> to vector<8x128xf32>
    %44 = vector.broadcast %42 : vector<1x128xf32> to vector<8x128xf32>
    %45 = arith.mulf %43, %44 : vector<8x128xf32>
    %46 = arith.addf %40, %45 : vector<8x128xf32>
    %47 = vector.extract_strided_slice %34 {offsets = [0, 2], sizes = [8, 1], strides = [1, 1]} : vector<8x4xf32> to vector<8x1xf32>
    %48 = vector.extract_strided_slice %33 {offsets = [2, 0], sizes = [1, 128], strides = [1, 1]} : vector<8x128xf32> to vector<1x128xf32>
    %49 = vector.broadcast %47 : vector<8x1xf32> to vector<8x128xf32>
    %50 = vector.broadcast %48 : vector<1x128xf32> to vector<8x128xf32>
    %51 = arith.mulf %49, %50 : vector<8x128xf32>
    %52 = arith.addf %46, %51 : vector<8x128xf32>
    %53 = vector.extract_strided_slice %34 {offsets = [0, 3], sizes = [8, 1], strides = [1, 1]} : vector<8x4xf32> to vector<8x1xf32>
    %54 = vector.extract_strided_slice %33 {offsets = [3, 0], sizes = [1, 128], strides = [1, 1]} : vector<8x128xf32> to vector<1x128xf32>
    %55 = vector.broadcast %53 : vector<8x1xf32> to vector<8x128xf32>
    %56 = vector.broadcast %54 : vector<1x128xf32> to vector<8x128xf32>
    %57 = arith.mulf %55, %56 : vector<8x128xf32>
    %58 = arith.addf %52, %57 : vector<8x128xf32>
    %c160 = arith.constant 160 : index
    %c0_17 = arith.constant 0 : index
    %59 = vector.load %arg2[%c160, %c0_17] : memref<168x256xf32, #tpu.memory_space<vmem>>, vector<1x128xf32>
    %60 = vector.broadcast %59 : vector<1x128xf32> to vector<8x128xf32>
    %61 = arith.addf %58, %60 : vector<8x128xf32>
    %cst_18 = arith.constant 0.000000e+00 : f32
    %62 = vector.broadcast %cst_18 : f32 to vector<8x128xf32>
    %63 = arith.maximumf %61, %62 : vector<8x128xf32>
    %c160_19 = arith.constant 160 : index
    %c128_20 = arith.constant 128 : index
    %64 = vector.load %arg2[%c160_19, %c128_20] : memref<168x256xf32, #tpu.memory_space<vmem>>, vector<1x128xf32>
    %c152_21 = arith.constant 152 : index
    %c128_22 = arith.constant 128 : index
    %65 = vector.load %arg2[%c152_21, %c128_22] : memref<168x256xf32, #tpu.memory_space<vmem>>, vector<1x1xf32>
    %66 = vector.broadcast %64 : vector<1x128xf32> to vector<8x128xf32>
    %67 = arith.mulf %63, %66 : vector<8x128xf32>
    %cst_23 = arith.constant dense<0.000000e+00> : vector<8xf32>
    %68 = vector.multi_reduction <add>, %67, %cst_23 [1] : vector<8x128xf32> to vector<8xf32>
    %69 = vector.shape_cast %68 : vector<8xf32> to vector<8x1xf32>
    %70 = vector.broadcast %65 : vector<1x1xf32> to vector<8x1xf32>
    %71 = arith.addf %69, %70 : vector<8x1xf32>
    %c0_24 = arith.constant 0 : index
    %c0_25 = arith.constant 0 : index
    %72 = vector.load %arg3[%c0_24, %c0_25] : memref<8x1xf32, #tpu.memory_space<vmem>>, vector<8x1xf32>
    tpu.vector_store %arg3[%c0_24, %c0_25], %71 {strides = array<i32>} : memref<8x1xf32, #tpu.memory_space<vmem>>, vector<8x1xf32>,
    return
  }
}

</mosaic_0001>

<bundles_post_ra>
// kernel: tpu_custom_call.1
= control target key start
LH: loop header
LB: loop body
LE: loop exit
PB: predicated region body
PF: predicated region fallthrough
CT: control target
= control target key end

     0   :  { %8 = vsyncpa [#allocation3], 0  ;;  %s596_s12 = smov [#allocation2]   ;;  %s672_s0 = inlined_call_operand.vmem [shape: f32[8,16], index: 0, kind: input, shape index: {}]   ;;  %s673_s1 = inlined_call_operand.vmem [shape: f32[8,4], index: 1, kind: input, shape index: {}]   ;;  %s674_s2 = inlined_call_operand.hbm [shape: f32[168,256], index: 2, kind: input, shape index: {}]   ;;  %s675_s3 = inlined_call_operand.vmem [shape: f32[8,1], index: 3, kind: output, shape index: {}]  }
   0x1   :  { %s18_s13 = sshll.u32 %s596_s12, 4  ;;  %s572_s16 = scalar_lea.hbm %s674_s2, 5376  ;;  %s19_s13 = int_to_ptr.vmem [resolvable:$true] %s18_s13 }
   0x2   :  { %p573_p0 = scmp.ne.s32.totalorder %s674_s2, %s572_s16  ;;  %p576_p1 = scmp.lt.u32.totalorder %s572_s16, %s674_s2 }
   0x4   :  { %p578_p2 = pnand %p576_p1, %p573_p0 }
   0x6   :  { %581 = shalt.err (!%p578_p2)
}
   0x7   :  { %s582_s21 = scalar_lea.vmem %s19_s13, 5376  ;;  %p587_p4 = scmp.lt.s32.totalorder %s19_s13, %s19_s13 }
   0x8   :  { %p583_p3 = scmp.ne.s32.totalorder %s19_s13, %s582_s21  ;;  %p588_p5 = scmp.lt.s32.totalorder %s582_s21, %s582_s21 }
   0xa   :  { %p589_p6 = por %p588_p5, %p587_p4 }
   0xc   :  { %p590_p7 = pnand %p589_p6, %p583_p3 }
   0xe   :  { %593 = shalt.err (!%p590_p7)
}
   0xf   :  { %s597_s22 = smov 256   ;;  %s598_s23 = smov 16  }
  0x10   :  { %24 = dma.hbm_to_vmem [thread:$0]  %s674_s2, 5376, %s19_s13, [#allocation3], %s597_s22, %s597_s22, %s598_s23  }
  0x11   :  { %594 = dma.done.wait [#allocation3], 5376  }
  0x12   :  { %595 = vsyncadd [#allocation3], 4294961920  ;;  %v599_v0 = vmov 0.0   ;;  %v29_v1 = vld [vmem:[#allocation2 + $0x8] sm:$0xff]  ;;  %v31_v2 = vld [vmem:[#allocation2 + $0x18] sm:$0xff]  ;;  %vm46_vm0 = vcmask 130048   ;;  %v36_v62 = vlaneseq }
  0x13   :  { %114 = vmatprep.mubr.f32.mxu0 %v599_v0  ;;  %v28_v3 = vld [vmem:[#allocation2] sm:$0xff]  ;;  %v501_v4 = vpack.c.bf16 %v31_v2, %v29_v1  ;;  %v30_v5 = vld [vmem:[#allocation2 + $0x10] sm:$0xff]  ;;  %v181_v11 = vld [vmem:[#allocation2 + $0x38] sm:$0xff]  ;;  %v600_v13 = vmov 0.0|0.0   ;;  %vm601_vm1 = vmmov 0   ;;  %v602_v58 = vmov 0  }
  0x14   :  { %v503_v6 = vpack.c.bf16 %v30_v5, %v28_v3  ;;  %v34_v7 = vld [vmem:[%s672_s0] sm:$0xff]  ;;  %v165_v8 = vld [vmem:[#allocation2 + $0x30] sm:$0xff]  ;;  %v182_v12 = vld [vmem:[#allocation2 + $0x48] sm:$0xff]  ;;  %505 = vmatprep.subr.bf16.mxu1 %v600_v13  ;;  %463 = vmatprep.mubr.msk.f32.mxu1 %vm601_vm1, %v599_v0  ;;  %v603_v59 = vmov 2   ;;  %v604_v60 = vmov 1   ;;  %v605_v61 = vmov 3  }
  0x15   :  { %502 = vmatprep.subr.bf16.mxu0 %v501_v4  ;;  %v166_v9 = vld [vmem:[#allocation2 + $0x40] sm:$0xff]  ;;  %v506_v14 = vpack.c.bf16 %v182_v12, %v181_v11  ;;  %v167_v15 = vld [vmem:[#allocation2 + $0x50] sm:$0xff]  ;;  %v183_v18 = vld [vmem:[#allocation2 + $0x58] sm:$0xff]  ;;  %563 = vset.pattern.permute.xlu0 %v602_v58  ;;  %v663_v63 = vshrl.u32 %v36_v62, 7  ;;  %vm389_vm2 = vcmask 7168  }
  0x16   :  { %504 = vmatpush1.bf16.msra.mxu0 %v503_v6  ;;  %v530_v10 = vpack.c.bf16 %v166_v9, %v165_v8  ;;  %v168_v16 = vld [vmem:[#allocation2 + $0x60] sm:$0xff]  ;;  %v184_v19 = vld [vmem:[#allocation2 + $0x68] sm:$0xff]  ;;  %v169_v21 = vld [vmem:[#allocation2 + $0x70] sm:$0xff]  ;;  %565 = vset.pattern.permute.xlu1 %v603_v59 }
  0x17   :  { %529 = vmatprep.subr.bf16.mxu0 %v600_v13  ;;  %507 = vmatpush3.bf16.msra.mxu1 %v506_v14  ;;  %v533_v17 = vpack.c.bf16 %v168_v16, %v167_v15  ;;  %v509_v20 = vpack.c.bf16 %v184_v19, %v183_v18  ;;  %v170_v22 = vld [vmem:[#allocation2 + $0x80] sm:$0xff]  ;;  %v185_v24 = vld [vmem:[#allocation2 + $0x78] sm:$0xff]  ;;  %v186_v25 = vld [vmem:[#allocation2 + $0x88] sm:$0xff]  ;;  %v42_v2 = vsub.s32 1, %v663_v63  ;;  %v376_v59 = vsub.s32 3, %v663_v63 }
  0x18   :  { %508 = vmatprep.subr.bf16.mxu1 %v600_v13  ;;  %v536_v23 = vpack.c.bf16 %v170_v22, %v169_v21  ;;  %v512_v26 = vpack.c.bf16 %v186_v25, %v185_v24  ;;  %v171_v27 = vld [vmem:[#allocation2 + $0x90] sm:$0xff]  ;;  %v172_v28 = vld [vmem:[#allocation2 + $0xa0] sm:$0xff]  ;;  %v187_v30 = vld [vmem:[#allocation2 + $0x98] sm:$0xff] }
  0x19   :  { %396 = vmatmul.mubr.msk.f32.vlgmr.msra.gmra.mrb[0].mxu0 %vm46_vm0, %v34_v7  ;;  %v539_v29 = vpack.c.bf16 %v172_v28, %v171_v27  ;;  %v188_v31 = vld [vmem:[#allocation2 + $0xa8] sm:$0xff]  ;;  %v173_v33 = vld [vmem:[#allocation2 + $0xb0] sm:$0xff]  ;;  %v174_v34 = vld [vmem:[#allocation2 + $0xc0] sm:$0xff] }
  0x1a   :  { %531 = vmatpush3.bf16.msra.mxu0 %v530_v10  ;;  %v515_v32 = vpack.c.bf16 %v188_v31, %v187_v30  ;;  %v542_v35 = vpack.c.bf16 %v174_v34, %v173_v33  ;;  %v189_v36 = vld [vmem:[#allocation2 + $0xb8] sm:$0xff]  ;;  %v190_v37 = vld [vmem:[#allocation2 + $0xc8] sm:$0xff]  ;;  %v175_v39 = vld [vmem:[#allocation2 + $0xd0] sm:$0xff]  ;;  %498 = vmatprep.mubr.msk.f32.mxu0 %vm601_vm1, %v599_v0  ;;  %v38_v0 = vsub.s32 0, %v663_v63 }
  0x1b   :  { %532 = vmatprep.subr.bf16.mxu0 %v600_v13  ;;  %510 = vmatpush3.bf16.msra.mxu1 %v509_v20  ;;  %v518_v38 = vpack.c.bf16 %v190_v37, %v189_v36  ;;  %v176_v40 = vld [vmem:[#allocation2 + $0xe0] sm:$0xff]  ;;  %v191_v42 = vld [vmem:[#allocation2 + $0xd8] sm:$0xff]  ;;  %v192_v43 = vld [vmem:[#allocation2 + $0xe8] sm:$0xff] }
  0x1c   :  { %511 = vmatprep.subr.bf16.mxu1 %v600_v13  ;;  %v545_v41 = vpack.c.bf16 %v176_v40, %v175_v39  ;;  %v177_v44 = vld [vmem:[#allocation2 + $0xf0] sm:$0xff]  ;;  %v521_v45 = vpack.c.bf16 %v192_v43, %v191_v42  ;;  %v178_v46 = vld [vmem:[#allocation2 + $0x100] sm:$0xff]  ;;  %v193_v47 = vld [vmem:[#allocation2 + $0xf8] sm:$0xff] }
  0x1d   :  { %v194_v48 = vld [vmem:[#allocation2 + $0x108] sm:$0xff]  ;;  %v548_v49 = vpack.c.bf16 %v178_v46, %v177_v44  ;;  %v179_v51 = vld [vmem:[#allocation2 + $0x110] sm:$0xff]  ;;  %v180_v52 = vld [vmem:[#allocation2 + $0x120] sm:$0xff] }
  0x1e   :  { %534 = vmatpush3.bf16.msra.mxu0 %v533_v17  ;;  %v524_v50 = vpack.c.bf16 %v194_v48, %v193_v47  ;;  %v195_v53 = vld [vmem:[#allocation2 + $0x118] sm:$0xff]  ;;  %v196_v54 = vld [vmem:[#allocation2 + $0x128] sm:$0xff]  ;;  %v551_v55 = vpack.c.bf16 %v180_v52, %v179_v51  ;;  %v338_v57 = vld [vmem:[%s673_s1] sm:$0xff] }
  0x1f   :  { %535 = vmatprep.subr.bf16.mxu0 %v600_v13  ;;  %513 = vmatpush3.bf16.msra.mxu1 %v512_v26  ;;  %v527_v56 = vpack.c.bf16 %v196_v54, %v195_v53  ;;  %v33_v1 = vld [vmem:[#allocation2 + $0x20] ss:$8 sm:$0x3]  ;;  %v337_v54 = vld [vmem:[#allocation2 + $0x130] sm:$0xff] }
  0x20   :  { %514 = vmatprep.subr.bf16.mxu1 %v600_v13  ;;  %341 = vperm.xlu0 %563, %v338_v57   ;;  %v39_v3 = vrot.slane %v33_v1, %v38_v0  ;;  %v43_v4 = vrot.slane %v33_v1, %v42_v2  ;;  %v357_v58 = vrot.slane %v337_v54, %v42_v2 }
  0x21   :  { %361 = vperm.xlu1 %565, %v338_v57  }
  0x22   :  { %537 = vmatpush3.bf16.msra.mxu0 %v536_v23 }
  0x23   :  { %538 = vmatprep.subr.bf16.mxu0 %v600_v13  ;;  %516 = vmatpush3.bf16.msra.mxu1 %v515_v32 }
  0x24   :  { %517 = vmatprep.subr.bf16.mxu1 %v600_v13  ;;  %564 = vset.pattern.permute.xlu0 %v604_v60 }
  0x25   :  { %566 = vset.pattern.permute.xlu1 %v605_v61  ;;  %351 = vperm.xlu0 %564, %v338_v57  }
  0x26   :  { %540 = vmatpush3.bf16.msra.mxu0 %v539_v29  ;;  %371 = vperm.xlu1 %566, %v338_v57   ;;  %v366_v57 = vsub.s32 2, %v663_v63  ;;  %v383_v63 = vld [vmem:[#allocation2 + $0x148] ss:$0 sm:$0xff] }
  0x27   :  { %541 = vmatprep.subr.bf16.mxu0 %v600_v13  ;;  %519 = vmatpush3.bf16.msra.mxu1 %v518_v38 }
  0x28   :  { %520 = vmatprep.subr.bf16.mxu1 %v600_v13 }
  0x29   :  { %567 = vset.pattern.permute.xlu0 %v605_v61 }
  0x2a   :  { %543 = vmatpush3.bf16.msra.mxu0 %v542_v35 }
  0x2b   :  { %544 = vmatprep.subr.bf16.mxu0 %v600_v13  ;;  %522 = vmatpush3.bf16.msra.mxu1 %v521_v45 }
  0x2c   :  { %523 = vmatprep.subr.bf16.mxu1 %v600_v13 }
  0x2e   :  { %546 = vmatpush3.bf16.msra.mxu0 %v545_v41 }
  0x2f   :  { %547 = vmatprep.subr.bf16.mxu0 %v600_v13  ;;  %525 = vmatpush3.bf16.msra.mxu1 %v524_v50 }
  0x30   :  { %526 = vmatprep.subr.bf16.mxu1 %v600_v13 }
  0x32   :  { %549 = vmatpush3.bf16.msra.mxu0 %v548_v49 }
  0x33   :  { %550 = vmatprep.subr.bf16.mxu0 %v600_v13  ;;  %528 = vmatpush3.bf16.msra.mxu1 %v527_v56 }
  0x36   :  { %552 = vmatpush3.bf16.msra.mxu0 %v551_v55  ;;  %v347_v55 = vrot.slane %v337_v54, %v38_v0 }
  0x9f   :  { %v342_v53 = vpop.permute.xlu0 %341 }
  0xa0   :  { %v362_v56 = vpop.permute.xlu1 %361  ;;  %v348_v62 = vmul.f32 %v347_v55, %v342_v53 }
  0xa4   :  { %v352_v60 = vpop.permute.xlu0 %351 }
  0xec   :  { %v116_v5 = vpop.f32.mrb[0].mxu0 }
  0xed   :  { %v117_v6 = vadd.f32 %v116_v5, %v39_v3  ;;  %v118_v7 = vpop.f32.mrb[1].mxu0  ;;  %v367_v5 = vrot.slane %v337_v54, %v366_v57 }
  0xee   :  { %v119_v8 = vadd.f32 %v118_v7, %v43_v4  ;;  %v358_v7 = vmul.f32 %v357_v58, %v352_v60 }
  0xef   :  { %v121_v9 = vmax.f32 %v117_v6, 0.0 }
  0xf0   :  { %v122_v10 = vmax.f32 %v119_v8, 0.0  ;;  %v377_v8 = vrot.slane %v337_v54, %v376_v59 }
  0xf1   :  { %v123_v11 = vrot.slane %v121_v9, 4  ;;  %v137_v12 = vmul.f32 %v121_v9, %v121_v9 }
  0xf2   :  { %v129_v13 = vrot.slane %v122_v10, 4  ;;  %v138_v14 = vmul.f32 %v122_v10, %v122_v10 }
  0xf3   :  { %v124_v15 = vadd.f32 %v123_v11, %v121_v9  ;;  %v139_v16 = vrot.slane %v137_v12, 4  ;;  %v368_v11 = vmul.f32 %v367_v5, %v362_v56 }
  0xf4   :  { %v130_v17 = vadd.f32 %v129_v13, %v122_v10  ;;  %v145_v18 = vrot.slane %v138_v14, 4 }
  0xf5   :  { %v125_v19 = vrot.slane %v124_v15, 2  ;;  %v140_v20 = vadd.f32 %v139_v16, %v137_v12 }
  0xf6   :  { %v131_v21 = vrot.slane %v130_v17, 2  ;;  %v146_v22 = vadd.f32 %v145_v18, %v138_v14  ;;  %v380_v14 = vld [vmem:[#allocation2 + $0x140] ss:$0 sm:$0xff]  ;;  %v384_v18 = vld [vmem:[#allocation2 + $0x138] ss:$0 sm:$0xff] }
  0xf7   :  { %v126_v23 = vadd.f32 %v125_v19, %v124_v15  ;;  %v141_v24 = vrot.slane %v140_v20, 2 }
  0xf8   :  { %v147_v25 = vrot.slane %v146_v22, 2  ;;  %v132_v26 = vadd.f32 %v131_v21, %v130_v17 }
  0xf9   :  { %v127_v27 = vrot.slane %v126_v23, 1  ;;  %v142_v28 = vadd.f32 %v141_v24, %v140_v20 }
  0xfa   :  { %v148_v29 = vadd.f32 %v147_v25, %v146_v22  ;;  %v133_v30 = vrot.slane %v132_v26, 1 }
  0xfb   :  { %v128_v31 = vadd.f32 %v127_v27, %v126_v23  ;;  %v143_v32 = vrot.slane %v142_v28, 1 }
  0xfc   :  { %v149_v33 = vrot.slane %v148_v29, 1  ;;  %v134_v34 = vadd.f32 %v133_v30, %v132_v26 }
  0xfd   :  { %v135_v35 = vmul.f32 0.125, %v128_v31  ;;  %v144_v36 = vadd.f32 %v143_v32, %v142_v28 }
  0xfe   :  { %v136_v37 = vmul.f32 0.125, %v134_v34  ;;  %v150_v38 = vadd.f32 %v149_v33, %v148_v29 }
  0xff   :  { %v151_v39 = vmul.f32 0.125, %v144_v36  ;;  %v153_v40 = vmul.f32 %v135_v35, %v135_v35  ;;  %v157_v47 = vsub.f32 %v121_v9, %v135_v35  ;;  %v372_v9 = vpop.permute.xlu1 %371 }
 0x100   :  { %v152_v41 = vmul.f32 0.125, %v150_v38  ;;  %v154_v42 = vmul.f32 %v136_v37, %v136_v37  ;;  %v158_v49 = vsub.f32 %v122_v10, %v136_v37  ;;  %v378_v12 = vmul.f32 %v377_v8, %v372_v9 }
 0x101   :  { %v155_v43 = vsub.f32 %v151_v39, %v153_v40 }
 0x102   :  { %v156_v44 = vsub.f32 %v152_v41, %v154_v42 }
 0x103   :  { %v159_v45 = vadd.f32 1e-05, %v155_v43 }
 0x104   :  { %v160_v46 = vadd.f32 1e-05, %v156_v44 }
 0x105   :  { %568 = vrsqrt.f32 %v159_v45 }
 0x106   :  { %570 = vrsqrt.f32 %v160_v46 }
 0x10f   :  { %v569_v48 = vpop.eup %568 }
 0x110   :  { %v571_v50 = vpop.eup %570  ;;  %v163_v51 = vmul.f32 %v569_v48, %v157_v47 }
 0x111   :  { %v164_v52 = vmul.f32 %v571_v50, %v158_v49 }
 0x112   :  { %499 = vmatmul.mubr.f32.vlgmr.msra.gmra.mrb[2].mxu0 %v163_v51 }
 0x113   :  { %464 = vmatmul.mubr.f32.vlgmr.msra.gmra.mrb[0].mxu1 %v164_v52 }
 0x1e5   :  { %v333_v61 = vpop.f32.mrb[2].mxu0 }
 0x1e6   :  { %v263_v1 = vpop.f32.mrb[0].mxu1  ;;  %v500_v3 = vpop.f32.mrb[3].mxu0 }
 0x1e7   :  { %v334_v4 = vadd.f32 %v333_v61, %v263_v1  ;;  %v465_v6 = vpop.f32.mrb[1].mxu1 }
 0x1e9   :  { %v349_v10 = vadd.f32 %v348_v62, %v334_v4 }
 0x1eb   :  { %v359_v0 = vadd.f32 %v358_v7, %v349_v10 }
 0x1ed   :  { %v369_v13 = vadd.f32 %v368_v11, %v359_v0 }
 0x1ef   :  { %v379_v2 = vadd.f32 %v378_v12, %v369_v13 }
 0x1f1   :  { %v381_v15 = vadd.f32 %v380_v14, %v379_v2 }
 0x1f3   :  { %v382_v16 = vmax.f32 %v381_v15, 0.0 }
 0x1f5   :  { %v385_v17 = vmul.f32 %v383_v63, %v382_v16 }
 0x1f7   :  { %386 = vadd.xlane.f32.xlu1 %v385_v17 }
 0x284   :  { %v387_v19 = vpop.xlane.xlu1 %386 }
 0x285   :  { %v388_v20 = vadd.f32 %v387_v19, %v384_v18 }
 0x287   :  { %390 = vst.msk [vmem:[%s675_s3] sm:$0xff] %vm389_vm2, %v388_v20 }
 0x288   :  { %395 = vsyncpa [#allocation3], 1 }

</bundles_post_ra>
